<compile_context>
chip_gen: v5e
topology: v5e:2x2
jax: 0.10.0
libtpu: 0.0.40
codegen_flags: <defaults>
</compile_context>

<pallas_src>
import math

import jax
import jax.numpy as jnp
from jax.experimental import pallas as pl
from jax.experimental.pallas import tpu as pltpu


def _round_up(v, mult):
    return -(-v // mult) * mult


def _vmem_limit_bytes():
    """Per-generation scoped-VMEM limit: ~75% of physical per-core VMEM, capped at
    96 MiB (=> 96 MiB on 128-MiB v5e/v6e, 48 MiB on 64-MiB-per-TC v7x)."""
    cap = 64 * 1024 * 1024  # conservative default if the query is unavailable
    try:
        cap = int(pltpu.get_tpu_info().vmem_capacity_bytes)
    except Exception:
        pass
    return int(min(96 * 1024 * 1024, cap * 3 // 4))


def _choose_tiles(m, d_feature, d_model_pad, itemsize, vmem_limit):
    """Pick (tm, tn).  tn (lane axis) bounds the resident weight to <=25% of the
    budget (multiple of 128 that divides d_model_pad).  tm is the largest power-of-two
    multiple of the dtype's sublane packing whose double-buffered x/out blocks plus the
    resident params plus the f32 dot temporary fit the budget."""
    budget = int(vmem_limit * 0.75)        # headroom for compiler-internal scratch
    sub = max(8, 32 // itemsize)           # 8 rows f32, 16 bf16, 32 int8/fp8

    # Weight + bias have a constant block index but are still double-buffered by the
    # default pipeline, so count them twice.
    # TODO(synk): switch weight/bias to pipeline_mode=pl.Buffered(1) once universally
    # accepted; that halves this term and frees room for a larger tm.
    def resident_bytes(tn_):
        return 2 * (d_feature * tn_ + tn_) * itemsize

    tn = d_model_pad
    if resident_bytes(tn) > budget // 4:
        cand = [c for c in range(128, d_model_pad + 1, 128) if d_model_pad % c == 0]
        tn = 128
        for c in reversed(cand):
            if resident_bytes(c) <= budget // 4:
                tn = c
                break

    def per_tm_bytes(tm_):
        # double-buffered x block + double-buffered out block + f32 dot temporary
        return 2 * tm_ * (d_feature + tn) * itemsize + tm_ * tn * 4

    tm = 2048
    while tm > sub and resident_bytes(tn) + per_tm_bytes(tm) > budget:
        tm //= 2
    tm = max(sub, tm)
    if m < tm:
        tm = max(sub, _round_up(m, sub))
    return tm, tn


def _make_kernel(scale):
    def kernel(x_ref, w_ref, b_ref, o_ref):
        # x_ref: [tm, d_feature]   (M tile, marches along the grid's M axis)
        # w_ref: [d_feature, tn]   (K,N layout -> plain MXU matmul, no per-step vxpose)
        # b_ref: [1, tn]
        # o_ref: [tm, tn]          (lane-dense: tn is a multiple of 128)
        y = jnp.dot(x_ref[...], w_ref[...], preferred_element_type=jnp.float32)
        o_ref[...] = ((y + b_ref[...]) * scale).astype(o_ref.dtype)

    return kernel


def linear_embedding(x, weight, bias):
    """x: [batch, seq, d_feature]; weight: [d_model, d_feature] (PyTorch layout);
    bias: [d_model]. Returns [batch, seq, d_model] = (x @ W.T + b) * sqrt(d_model)."""
    batch, seq, d_feature = x.shape
    d_model = weight.shape[0]
    m = batch * seq
    scale = float(math.sqrt(d_model))
    itemsize = jnp.dtype(x.dtype).itemsize

    # One-time layout fixups on the SMALL parameters only (x is never re-streamed):
    #   * transpose W to (K, N) so the in-kernel dot needs no transpose
    #   * pad N up to a multiple of 128 so output stores are unmasked vst
    d_model_pad = _round_up(d_model, 128)
    w_kn = jnp.transpose(weight)                       # [d_feature, d_model]
    b_2d = bias.reshape(1, d_model)
    if d_model_pad != d_model:
        w_kn = jnp.pad(w_kn, ((0, 0), (0, d_model_pad - d_model)))
        b_2d = jnp.pad(b_2d, ((0, 0), (0, d_model_pad - d_model)))

    x2d = x.reshape(m, d_feature)                      # no padding / extra HBM pass

    vmem_limit = _vmem_limit_bytes()
    tm, tn = _choose_tiles(m, d_feature, d_model_pad, itemsize, vmem_limit)

    grid = (pl.cdiv(m, tm), d_model_pad // tn)

    cost = pl.CostEstimate(
        flops=2 * m * d_feature * d_model_pad,
        transcendentals=0,
        bytes_accessed=(m * d_feature + d_feature * d_model_pad + d_model_pad
                        + m * d_model_pad) * itemsize,
    )

    out2d = pl.pallas_call(
        _make_kernel(scale),
        out_shape=jax.ShapeDtypeStruct((m, d_model_pad), x.dtype),
        grid_spec=pl.GridSpec(
            grid=grid,
            in_specs=[
                # x tile marches along M; weight/bias tiles march along N only, so for
                # a single N tile they stay VMEM-resident across all grid steps.
                pl.BlockSpec((tm, d_feature), lambda i, j: (i, 0)),
                pl.BlockSpec((d_feature, tn), lambda i, j: (0, j)),
                pl.BlockSpec((1, tn), lambda i, j: (0, j)),
            ],
            out_specs=pl.BlockSpec((tm, tn), lambda i, j: (i, j)),
        ),
        compiler_params=pltpu.CompilerParams(
            # Both axes are embarrassingly parallel -> megacore sharding on v7x.
            dimension_semantics=("parallel", "parallel"),
            vmem_limit_bytes=vmem_limit,
        ),
        cost_estimate=cost,
    )(x2d, w_kn, b_2d)

    if d_model_pad != d_model:
        out2d = out2d[:, :d_model]
    return out2d.reshape(batch, seq, d_model)


if __name__ == "__main__":
    # Small shapes consistent with the module's forward.
    batch, seq, d_feature, d_model = 2, 8, 4, 32

    key = jax.random.PRNGKey(0)
    kx, kw, kb = jax.random.split(key, 3)

    x = jax.random.normal(kx, (batch, seq, d_feature), dtype=jnp.float32)

    # Deterministic param init mimicking nn.Linear's uniform(-1/sqrt(in), 1/sqrt(in)).
    limit = 1.0 / math.sqrt(d_feature)
    weight = jax.random.uniform(
        kw, (d_model, d_feature), minval=-limit, maxval=limit, dtype=jnp.float32
    )
    bias = jax.random.uniform(
        kb, (d_model,), minval=-limit, maxval=limit, dtype=jnp.float32
    )

    out = jax.block_until_ready(linear_embedding(x, weight, bias))

    # Reference check in plain JAX.
    ref = (x @ weight.T + bias) * math.sqrt(d_model)
    assert out.shape == (batch, seq, d_model)
    assert jnp.allclose(out, ref, atol=1e-5, rtol=1e-5), "mismatch vs reference"

    print("KERNEL_OK")
</pallas_src>

<mosaic_0001>
module attributes {stable_mosaic.version = 11 : i64} {
  func.func @kernel(%arg0: i32, %arg1: i32, %arg2: memref<16x4xf32, #tpu.memory_space<vmem>>, %arg3: memref<4x128xf32, #tpu.memory_space<vmem>>, %arg4: memref<1x128xf32, #tpu.memory_space<vmem>>, %arg5: memref<16x128xf32, #tpu.memory_space<vmem>>) attributes {dimension_semantics = [#tpu.dimension_semantics<parallel>, #tpu.dimension_semantics<parallel>], iteration_bounds = array<i64: 1, 1>, scalar_prefetch = 0 : i64, scratch_operands = 0 : i64, tpu.core_type = #tpu.core_type<tc>, window_params = [{transform_indices = @transform_0, window_bounds = array<i64: 16, 4>}, {transform_indices = @transform_1, window_bounds = array<i64: 4, 128>}, {transform_indices = @transform_2, window_bounds = array<i64: 1, 128>}, {transform_indices = @transform_3, window_bounds = array<i64: 16, 128>}]} {
    %c0 = arith.constant 0 : index
    %c0_0 = arith.constant 0 : index
    %0 = vector.load %arg2[%c0, %c0_0] : memref<16x4xf32, #tpu.memory_space<vmem>>, vector<16x4xf32>
    %c0_1 = arith.constant 0 : index
    %c0_2 = arith.constant 0 : index
    %1 = vector.load %arg3[%c0_1, %c0_2] : memref<4x128xf32, #tpu.memory_space<vmem>>, vector<4x128xf32>
    %cst = arith.constant dense<0.000000e+00> : vector<16x128xf32>
    %2 = tpu.matmul %0, %1, %cst {dimension_numbers = #tpu.dot_dimension_numbers<[1], [0], [0], [1], [0, 0, 1, 1], [], []>} : vector<16x4xf32>, vector<4x128xf32>, vector<16x128xf32> -> vector<16x128xf32>
    %c0_3 = arith.constant 0 : index
    %c0_4 = arith.constant 0 : index
    %3 = vector.load %arg4[%c0_3, %c0_4] : memref<1x128xf32, #tpu.memory_space<vmem>>, vector<1x128xf32>
    %4 = vector.broadcast %3 : vector<1x128xf32> to vector<16x128xf32>
    %5 = arith.addf %2, %4 : vector<16x128xf32>
    %cst_5 = arith.constant 5.65685415 : f32
    %6 = vector.broadcast %cst_5 : f32 to vector<16x128xf32>
    %7 = arith.mulf %5, %6 : vector<16x128xf32>
    %c0_6 = arith.constant 0 : index
    %c0_7 = arith.constant 0 : index
    %8 = vector.load %arg5[%c0_6, %c0_7] : memref<16x128xf32, #tpu.memory_space<vmem>>, vector<16x128xf32>
    tpu.vector_store %arg5[%c0_6, %c0_7], %7 {strides = array<i32>} : memref<16x128xf32, #tpu.memory_space<vmem>>, vector<16x128xf32>,
    return
  }
  func.func @transform_0(%arg0: i32, %arg1: i32) -> (i32, i32) {
    %c0_i32 = arith.constant 0 : i32
    %c0_i32_0 = arith.constant 0 : i32
    return %arg0, %c0_i32 : i32, i32
  }
  func.func @transform_1(%arg0: i32, %arg1: i32) -> (i32, i32) {
    %c0_i32 = arith.constant 0 : i32
    %c0_i32_0 = arith.constant 0 : i32
    return %c0_i32, %arg1 : i32, i32
  }
  func.func @transform_2(%arg0: i32, %arg1: i32) -> (i32, i32) {
    %c0_i32 = arith.constant 0 : i32
    %c0_i32_0 = arith.constant 0 : i32
    return %c0_i32, %arg1 : i32, i32
  }
  func.func @transform_3(%arg0: i32, %arg1: i32) -> (i32, i32) {
    %c0_i32 = arith.constant 0 : i32
    return %arg0, %arg1 : i32, i32
  }
}

</mosaic_0001>

<bundles_post_ra>
// kernel: tpu_custom_call.1
= control target key start
LH: loop header
LB: loop body
LE: loop exit
PB: predicated region body
PF: predicated region fallthrough
CT: control target
= control target key end

     0   :  { %vm29_vm0 = vcmask 1043456   ;;  %vm22_vm1 = vcmask 31744   ;;  %s150_s0 = inlined_call_operand.vmem [shape: f32[16,4], index: 0, kind: input, shape index: {}]   ;;  %s151_s1 = inlined_call_operand.vmem [shape: f32[4,128], index: 1, kind: input, shape index: {}]   ;;  %s152_s2 = inlined_call_operand.vmem [shape: f32[1,128], index: 2, kind: input, shape index: {}]   ;;  %s153_s3 = inlined_call_operand.hbm [shape: f32[16,128], index: 3, kind: output, shape index: {}]  }
   0x1   :  { %v17_v0 = vld [vmem:[%s151_s1] sm:$0xf]  ;;  %v16_v2 = vld [vmem:[%s150_s0 + $0x8] sm:$0xff] }
   0x2   :  { %v15_v1 = vld [vmem:[%s150_s0] sm:$0xff]  ;;  %78 = vmatpush.msk.msra.mxu0 %vm29_vm0, %v17_v0  ;;  %81 = vmatpush.msk.msra.mxu1 %vm29_vm0, %v17_v0 }
   0x3   :  { %8 = vsyncpa [#allocation3], 0  ;;  %79 = vmatmul.msk.f32.vlgmr.msra.gmra.mxu0 %vm22_vm1, %v15_v1  ;;  %80 = vmatmul.msk.f32.vlgmr.msra.gmra.mxu1 %vm22_vm1, %v16_v2  ;;  %v85_v3 = vld [vmem:[%s152_s2] ss:$0 sm:$0xff]  ;;  %s112_s1 = smov [#allocation2]   ;;  %s66_s23 = sshll.u32 %s153_s3, 4  ;;  %s67_s23 = int_to_ptr.hbm [resolvable:$true] %s66_s23 }
   0x4   :  { %s64_s20 = sshll.u32 %s112_s1, 4  ;;  %s113_s0 = smov 128   ;;  %s65_s20 = int_to_ptr.vmem [resolvable:$true] %s64_s20 }
   0x5   :  { %s114_s24 = smov 8  }
  0x80   :  { %v50_v4 = vpop.f32.mrf.mxu0  ;;  %v53_v5 = vpop.f32.mrf.mxu1 }
  0x81   :  { %v51_v6 = vadd.f32 %v85_v3, %v50_v4  ;;  %v54_v7 = vadd.f32 %v85_v3, %v53_v5 }
  0x83   :  { %v56_v8 = vmul.f32 5.656854, %v51_v6  ;;  %v57_v9 = vmul.f32 5.656854, %v54_v7 }
  0x85   :  { %58 = vst [vmem:[#allocation2] sm:$0xff] %v56_v8 }
  0x86   :  { %59 = vst [vmem:[#allocation2 + $0x8] sm:$0xff] %v57_v9 }
  0x87   :  { %72 = dma.vmem_to_hbm [thread:$0]  %s65_s20, 256, %s67_s23, [#allocation3], %s113_s0, %s113_s0, %s114_s24  }
  0x88   :  { %110 = dma.done.wait [#allocation3], 256  }
  0x89   :  { %111 = vsyncadd [#allocation3], 4294967040 }
  0x8a   :  { %77 = vsyncpa [#allocation3], 1 }

</bundles_post_ra>
